<compile_context>
chip_gen: v5e
topology: v5e:2x2
jax: 0.10.0
libtpu: 0.0.40
codegen_flags: <defaults>
</compile_context>

<pallas_src>
import math
import functools

import jax
import jax.numpy as jnp
from jax.experimental import pallas as pl
from jax.experimental.pallas import tpu as pltpu

_LANE = 128
_SUBLANE = 8


def _round_up(n, m):
    return ((n + m - 1) // m) * m


def _vmem_capacity_bytes():
    try:
        return int(pltpu.get_tpu_info().vmem_capacity_bytes)
    except Exception:
        return 64 * 1024 * 1024  # conservative default (v7x per-TC VMEM)


def _is_v5():
    try:
        return "v5" in jax.devices()[0].device_kind.lower()
    except Exception:
        return False


# ----------------------------------------------------------------------------
# Parameter preparation (done once, outside the forward path)
# ----------------------------------------------------------------------------
def prepare_mlp_params(params, *, use_bf16=True, lane_pad=_LANE):
    """Pad hidden/output feature dims to lane multiples and cast weights once.

    params: list of (W, b) with W (in_features, out_features), b (out_features,)
    or (1, out_features). Returns a dict consumed by mlp_forward.
    """
    in_dim = params[0][0].shape[0]
    dims = [in_dim] + [W.shape[1] for W, _ in params]
    # Only pad the input dim when it is large AND lane-misaligned (padding x
    # costs a copy per forward; tiny in_dims stay unpadded -> full-array block).
    in_pad = _round_up(in_dim, lane_pad) if (in_dim >= 256 and in_dim % lane_pad) else in_dim
    padded = [in_pad] + [_round_up(d, lane_pad) for d in dims[1:]]
    wdtype = jnp.bfloat16 if use_bf16 else params[0][0].dtype

    layers = []
    for l, (W, b) in enumerate(params):
        kin, kout = padded[l], padded[l + 1]
        Wp = W
        if Wp.shape != (kin, kout):
            Wp = jnp.pad(Wp, ((0, kin - Wp.shape[0]), (0, kout - Wp.shape[1])))
        bp = jnp.reshape(b, (1, -1))
        if bp.shape[1] != kout:
            bp = jnp.pad(bp, ((0, 0), (0, kout - bp.shape[1])))
        layers.append((Wp.astype(wdtype), bp.astype(jnp.float32)))
    return {"layers": layers, "dims": dims, "padded": padded, "use_bf16": use_bf16}


# ----------------------------------------------------------------------------
# Fused, weight-resident kernel (one row tile, all layers)
# ----------------------------------------------------------------------------
def _make_fused_kernel(n_layers, act_dtype):
    def kernel(*refs):
        x_ref, o_ref = refs[0], refs[-1]
        wb = refs[1:-1]  # (W1, b1, ..., WL, bL) resident VMEM refs
        h = x_ref[...]
        for l in range(n_layers):
            w = wb[2 * l][...]
            b = wb[2 * l + 1][...]          # f32 bias
            acc = jnp.dot(h.astype(w.dtype), w, preferred_element_type=jnp.float32)
            acc = acc + b
            if l < n_layers - 1:
                h = jnp.maximum(acc, 0.0).astype(act_dtype)
            else:
                h = acc
        o_ref[...] = h.astype(o_ref.dtype)
    return kernel


def _run_fused(x2, prep, *, row_tile, act_dtype, out_dtype, vmem_limit,
               single_buffer_weights):
    n_layers = len(prep["layers"])
    padded = prep["padded"]
    in_pad, out_pad = padded[0], padded[-1]
    n_padded = x2.shape[0]
    flat_wb = [a for wb in prep["layers"] for a in wb]

    wb_kwargs = {}
    if single_buffer_weights:
        # Constant index_map -> no pipelining possible; single-buffer the weights.
        wb_kwargs["pipeline_mode"] = pl.Buffered(1)

    in_specs = [pl.BlockSpec((row_tile, in_pad), lambda i: (i, 0))]
    for a in flat_wb:
        in_specs.append(pl.BlockSpec(a.shape, lambda i: (0, 0), **wb_kwargs))

    return pl.pallas_call(
        _make_fused_kernel(n_layers, act_dtype),
        out_shape=jax.ShapeDtypeStruct((n_padded, out_pad), out_dtype),
        grid_spec=pltpu.PrefetchScalarGridSpec(
            num_scalar_prefetch=0,
            grid=(n_padded // row_tile,),
            in_specs=in_specs,
            out_specs=pl.BlockSpec((row_tile, out_pad), lambda i: (i, 0)),
        ),
        compiler_params=pltpu.CompilerParams(
            dimension_semantics=("parallel",),
            vmem_limit_bytes=vmem_limit,
        ),
    )(x2, *flat_wb)


# ----------------------------------------------------------------------------
# Layer-wise tiled fallback (weights too large for VMEM residency)
# ----------------------------------------------------------------------------
def _linear_kernel(x_ref, w_ref, b_ref, o_ref, acc_ref, *, relu):
    @pl.when(pl.program_id(2) == 0)
    def _():
        acc_ref[...] = jnp.zeros_like(acc_ref)

    acc_ref[...] += jnp.dot(x_ref[...].astype(w_ref.dtype), w_ref[...],
                            preferred_element_type=jnp.float32)

    @pl.when(pl.program_id(2) == pl.num_programs(2) - 1)
    def _():
        acc = acc_ref[...] + b_ref[...].astype(jnp.float32)
        if relu:
            acc = jnp.maximum(acc, 0.0)
        o_ref[...] = acc.astype(o_ref.dtype)


def _pick_tile(dim, candidates=(512, 256, 128)):
    for c in candidates:
        if dim % c == 0:
            return c
    return dim  # full-extent block (allowed when equal to the array dim)


def _linear_layerwise(h, W, b, *, relu, out_dtype, tm, vmem_budget):
    M, K = h.shape
    _, N = W.shape
    tn = _pick_tile(N)
    tk = _pick_tile(K)
    grid = (M // tm, N // tn, K // tk)

    itm_x = jnp.dtype(h.dtype).itemsize
    itm_w = jnp.dtype(W.dtype).itemsize
    itm_o = jnp.dtype(out_dtype).itemsize
    vmem_limit = int(min(vmem_budget, max(
        16 << 20,
        2 * (tm * tk * itm_x + tk * tn * itm_w + tm * tn * itm_o)
        + tm * tn * 4 + (2 << 20))))

    return pl.pallas_call(
        functools.partial(_linear_kernel, relu=relu),
        out_shape=jax.ShapeDtypeStruct((M, N), out_dtype),
        grid_spec=pltpu.PrefetchScalarGridSpec(
            num_scalar_prefetch=0,
            grid=grid,
            in_specs=[
                pl.BlockSpec((tm, tk), lambda i, j, k: (i, k)),
                pl.BlockSpec((tk, tn), lambda i, j, k: (k, j)),
                pl.BlockSpec((1, tn), lambda i, j, k: (0, j)),
            ],
            out_specs=pl.BlockSpec((tm, tn), lambda i, j, k: (i, j)),
            scratch_shapes=[pltpu.VMEM((tm, tn), jnp.float32)],
        ),
        compiler_params=pltpu.CompilerParams(
            dimension_semantics=("parallel", "parallel", "arbitrary"),
            vmem_limit_bytes=vmem_limit,
        ),
    )(h, W, b)


# ----------------------------------------------------------------------------
# Forward
# ----------------------------------------------------------------------------
def mlp_forward(x, params, *, use_bf16=True, force_layerwise=False):
    """x: (..., in_dim). params: raw [(W, b), ...] or a prepare_mlp_params() dict."""
    prep = params if isinstance(params, dict) else prepare_mlp_params(params, use_bf16=use_bf16)
    layers = prep["layers"]
    dims, padded = prep["dims"], prep["padded"]
    n_layers = len(layers)
    in_dim, out_dim = dims[0], dims[-1]
    in_pad, out_pad = padded[0], padded[-1]
    lead_shape = x.shape[:-1]
    assert x.shape[-1] == in_dim, (x.shape, in_dim)

    # bf16 inter-layer activations only where the VPU supports it (not v5e).
    act_dtype = jnp.bfloat16 if (prep["use_bf16"] and not _is_v5()) else jnp.float32

    x2 = x.reshape(-1, in_dim)
    n_rows = x2.shape[0]
    if in_pad != in_dim:
        x2 = jnp.pad(x2, ((0, 0), (0, in_pad - in_dim)))

    # ---- generation-aware VMEM budget (exact accounting, no blanket doubling) ----
    vmem_cap = _vmem_capacity_bytes()
    vmem_budget = int(vmem_cap * 0.85)       # leave headroom for compiler scratch
    headroom = 2 << 20
    x_itm = jnp.dtype(x.dtype).itemsize
    act_itm = jnp.dtype(act_dtype).itemsize
    w_bytes = sum(W.size * W.dtype.itemsize + b.size * b.dtype.itemsize
                  for W, b in layers)        # single-buffered (Buffered(1))
    widest = max(padded)

    def tile_bytes(rt):
        io = 2 * rt * in_pad * x_itm + 2 * rt * out_pad * x_itm   # double-buffered x/out
        live = 2 * rt * widest * 4 + rt * widest * act_itm        # live intermediates
        return io + live

    def fits(rt):
        return w_bytes + tile_bytes(rt) + headroom <= vmem_budget

    # ---- adaptive row tile ----
    row_tile = None
    if not force_layerwise:
        if n_rows <= 256:
            rt = max(_SUBLANE, _round_up(n_rows, _SUBLANE))
            row_tile = rt if fits(rt) else None
        else:
            max_tile = 512 if vmem_cap <= (80 << 20) else 1024    # smaller tiles on v7x
            tile_cap = _round_up((n_rows + 1) // 2, _SUBLANE)     # keep >=2 tiles (megacore)
            for cand in (1024, 512, 256, 128, 64, 32, 16, 8):
                if cand > max_tile or cand > tile_cap:
                    continue
                if fits(cand):
                    row_tile = cand
                    break

    if row_tile is not None:
        # -------- fused, weight-resident path --------
        n_padded = _round_up(n_rows, row_tile)
        xt = jnp.pad(x2, ((0, n_padded - n_rows), (0, 0))) if n_padded != n_rows else x2
        vmem_limit = int(min(vmem_budget,
                             max(16 << 20, w_bytes + tile_bytes(row_tile) + (4 << 20))))
        try:
            out = _run_fused(xt, prep, row_tile=row_tile, act_dtype=act_dtype,
                             out_dtype=x.dtype, vmem_limit=vmem_limit,
                             single_buffer_weights=True)
            out = jax.block_until_ready(out)
        except Exception:
            # pl.Buffered(1) unsupported in this jax -> default double-buffered weights.
            out = _run_fused(xt, prep, row_tile=row_tile, act_dtype=act_dtype,
                             out_dtype=x.dtype, vmem_limit=vmem_limit,
                             single_buffer_weights=False)
    else:
        # -------- layer-wise tiled fallback (classic M/N/K grid) --------
        tm = min(512, _round_up(n_rows, _SUBLANE))
        m_pad = _round_up(n_rows, tm)
        h = jnp.pad(x2, ((0, m_pad - n_rows), (0, 0))) if m_pad != n_rows else x2
        for l, (W, b) in enumerate(layers):
            last = l == n_layers - 1
            h = _linear_layerwise(h, W, b, relu=not last,
                                  out_dtype=x.dtype if last else act_dtype,
                                  tm=tm, vmem_budget=vmem_budget)
        out = h

    out = out[:n_rows, :out_dim]
    return out.reshape(*lead_shape, out_dim)


# ----------------------------------------------------------------------------
# Init / reference / demo
# ----------------------------------------------------------------------------
def init_mlp_params(key, in_dim, hidden_list, out_dim, dtype=jnp.float32):
    """Deterministic init mimicking nn.Linear's uniform(-1/sqrt(fan_in), 1/sqrt(fan_in))."""
    dims = [in_dim] + list(hidden_list) + [out_dim]
    params = []
    for i in range(len(dims) - 1):
        fan_in, fan_out = dims[i], dims[i + 1]
        key, kw, kb = jax.random.split(key, 3)
        bound = 1.0 / math.sqrt(fan_in)
        W = jax.random.uniform(kw, (fan_in, fan_out), dtype, -bound, bound)
        b = jax.random.uniform(kb, (1, fan_out), dtype, -bound, bound)
        params.append((W, b))
    return params


def mlp_reference(x, params):
    shape = x.shape[:-1]
    h = x.reshape(-1, x.shape[-1])
    for l, (W, b) in enumerate(params):
        h = h @ W + b.reshape(1, -1)
        if l < len(params) - 1:
            h = jnp.maximum(h, 0.0)
    return h.reshape(*shape, -1)


if __name__ == "__main__":
    in_dim, hidden_list, out_dim = 16, [32, 32], 8
    batch, seq = 2, 8  # leading dims of x; forward flattens them

    key = jax.random.PRNGKey(0)
    key, kx = jax.random.split(key)
    x = jax.random.normal(kx, (batch, seq, in_dim), jnp.float32)
    params = init_mlp_params(key, in_dim, hidden_list, out_dim)
    y_ref = mlp_reference(x, params)

    # 1) fused weight-resident path, exact f32 operands -> tight tolerance
    prep_f32 = prepare_mlp_params(params, use_bf16=False)
    y32 = jax.block_until_ready(mlp_forward(x, prep_f32))
    assert y32.shape == (batch, seq, out_dim), y32.shape
    assert jnp.allclose(y32, y_ref, atol=1e-5, rtol=1e-5), "f32 fused mismatch vs reference"

    # 2) fused path with bf16 operands (default, fast) -> bf16-appropriate tolerance
    prep_bf16 = prepare_mlp_params(params, use_bf16=True)
    y16 = jax.block_until_ready(mlp_forward(x, prep_bf16))
    assert y16.shape == (batch, seq, out_dim), y16.shape
    assert jnp.allclose(y16, y_ref, atol=5e-2, rtol=5e-2), "bf16 fused mismatch vs reference"

    # 3) layer-wise tiled fallback path (exercised explicitly), exact f32
    ylw = jax.block_until_ready(mlp_forward(x, prep_f32, force_layerwise=True))
    assert ylw.shape == (batch, seq, out_dim), ylw.shape
    assert jnp.allclose(ylw, y_ref, atol=1e-5, rtol=1e-5), "layer-wise mismatch vs reference"

    print("KERNEL_OK")
</pallas_src>

<mosaic_0001>
module attributes {stable_mosaic.version = 11 : i64} {
  func.func @kernel(%arg0: i32, %arg1: memref<16x16xf32, #tpu.memory_space<vmem>>, %arg2: memref<16x128xf32, #tpu.memory_space<vmem>>, %arg3: memref<1x128xf32, #tpu.memory_space<vmem>>, %arg4: memref<128x128xf32, #tpu.memory_space<vmem>>, %arg5: memref<1x128xf32, #tpu.memory_space<vmem>>, %arg6: memref<128x128xf32, #tpu.memory_space<vmem>>, %arg7: memref<1x128xf32, #tpu.memory_space<vmem>>, %arg8: memref<16x128xf32, #tpu.memory_space<vmem>>) attributes {dimension_semantics = [#tpu.dimension_semantics<parallel>], iteration_bounds = array<i64: 1>, scalar_prefetch = 0 : i64, scratch_operands = 0 : i64, tpu.core_type = #tpu.core_type<tc>, window_params = [{transform_indices = @transform_0, window_bounds = array<i64: 16, 16>}, {pipeline_mode = #tpu.pipeline_mode<synchronous>, transform_indices = @transform_1, window_bounds = array<i64: 16, 128>}, {pipeline_mode = #tpu.pipeline_mode<synchronous>, transform_indices = @transform_2, window_bounds = array<i64: 1, 128>}, {pipeline_mode = #tpu.pipeline_mode<synchronous>, transform_indices = @transform_3, window_bounds = array<i64: 128, 128>}, {pipeline_mode = #tpu.pipeline_mode<synchronous>, transform_indices = @transform_4, window_bounds = array<i64: 1, 128>}, {pipeline_mode = #tpu.pipeline_mode<synchronous>, transform_indices = @transform_5, window_bounds = array<i64: 128, 128>}, {pipeline_mode = #tpu.pipeline_mode<synchronous>, transform_indices = @transform_6, window_bounds = array<i64: 1, 128>}, {transform_indices = @transform_7, window_bounds = array<i64: 16, 128>}]} {
    %c0 = arith.constant 0 : index
    %c0_0 = arith.constant 0 : index
    %0 = vector.load %arg1[%c0, %c0_0] : memref<16x16xf32, #tpu.memory_space<vmem>>, vector<16x16xf32>
    %c0_1 = arith.constant 0 : index
    %c0_2 = arith.constant 0 : index
    %1 = vector.load %arg2[%c0_1, %c0_2] : memref<16x128xf32, #tpu.memory_space<vmem>>, vector<16x128xf32>
    %c0_3 = arith.constant 0 : index
    %c0_4 = arith.constant 0 : index
    %2 = vector.load %arg3[%c0_3, %c0_4] : memref<1x128xf32, #tpu.memory_space<vmem>>, vector<1x128xf32>
    %cst = arith.constant dense<0.000000e+00> : vector<16x128xf32>
    %3 = tpu.matmul %0, %1, %cst {dimension_numbers = #tpu.dot_dimension_numbers<[1], [0], [0], [1], [0, 0, 1, 1], [], []>} : vector<16x16xf32>, vector<16x128xf32>, vector<16x128xf32> -> vector<16x128xf32>
    %4 = vector.broadcast %2 : vector<1x128xf32> to vector<16x128xf32>
    %5 = arith.addf %3, %4 : vector<16x128xf32>
    %cst_5 = arith.constant 0.000000e+00 : f32
    %6 = vector.broadcast %cst_5 : f32 to vector<16x128xf32>
    %7 = arith.maximumf %5, %6 : vector<16x128xf32>
    %c0_6 = arith.constant 0 : index
    %c0_7 = arith.constant 0 : index
    %8 = vector.load %arg4[%c0_6, %c0_7] : memref<128x128xf32, #tpu.memory_space<vmem>>, vector<128x128xf32>
    %c0_8 = arith.constant 0 : index
    %c0_9 = arith.constant 0 : index
    %9 = vector.load %arg5[%c0_8, %c0_9] : memref<1x128xf32, #tpu.memory_space<vmem>>, vector<1x128xf32>
    %cst_10 = arith.constant dense<0.000000e+00> : vector<16x128xf32>
    %10 = tpu.matmul %7, %8, %cst_10 {dimension_numbers = #tpu.dot_dimension_numbers<[1], [0], [0], [1], [0, 0, 1, 1], [], []>} : vector<16x128xf32>, vector<128x128xf32>, vector<16x128xf32> -> vector<16x128xf32>
    %11 = vector.broadcast %9 : vector<1x128xf32> to vector<16x128xf32>
    %12 = arith.addf %10, %11 : vector<16x128xf32>
    %cst_11 = arith.constant 0.000000e+00 : f32
    %13 = vector.broadcast %cst_11 : f32 to vector<16x128xf32>
    %14 = arith.maximumf %12, %13 : vector<16x128xf32>
    %c0_12 = arith.constant 0 : index
    %c0_13 = arith.constant 0 : index
    %15 = vector.load %arg6[%c0_12, %c0_13] : memref<128x128xf32, #tpu.memory_space<vmem>>, vector<128x128xf32>
    %c0_14 = arith.constant 0 : index
    %c0_15 = arith.constant 0 : index
    %16 = vector.load %arg7[%c0_14, %c0_15] : memref<1x128xf32, #tpu.memory_space<vmem>>, vector<1x128xf32>
    %cst_16 = arith.constant dense<0.000000e+00> : vector<16x128xf32>
    %17 = tpu.matmul %14, %15, %cst_16 {dimension_numbers = #tpu.dot_dimension_numbers<[1], [0], [0], [1], [0, 0, 1, 1], [], []>} : vector<16x128xf32>, vector<128x128xf32>, vector<16x128xf32> -> vector<16x128xf32>
    %18 = vector.broadcast %16 : vector<1x128xf32> to vector<16x128xf32>
    %19 = arith.addf %17, %18 : vector<16x128xf32>
    %c0_17 = arith.constant 0 : index
    %c0_18 = arith.constant 0 : index
    %20 = vector.load %arg8[%c0_17, %c0_18] : memref<16x128xf32, #tpu.memory_space<vmem>>, vector<16x128xf32>
    tpu.vector_store %arg8[%c0_17, %c0_18], %19 {strides = array<i32>} : memref<16x128xf32, #tpu.memory_space<vmem>>, vector<16x128xf32>,
    return
  }
  func.func @transform_0(%arg0: i32) -> (i32, i32) {
    %c0_i32 = arith.constant 0 : i32
    %c0_i32_0 = arith.constant 0 : i32
    return %arg0, %c0_i32 : i32, i32
  }
  func.func @transform_1(%arg0: i32) -> (i32, i32) {
    %c0_i32 = arith.constant 0 : i32
    %c0_i32_0 = arith.constant 0 : i32
    %c0_i32_1 = arith.constant 0 : i32
    return %c0_i32, %c0_i32_0 : i32, i32
  }
  func.func @transform_2(%arg0: i32) -> (i32, i32) {
    %c0_i32 = arith.constant 0 : i32
    %c0_i32_0 = arith.constant 0 : i32
    %c0_i32_1 = arith.constant 0 : i32
    return %c0_i32, %c0_i32_0 : i32, i32
  }
  func.func @transform_3(%arg0: i32) -> (i32, i32) {
    %c0_i32 = arith.constant 0 : i32
    %c0_i32_0 = arith.constant 0 : i32
    %c0_i32_1 = arith.constant 0 : i32
    return %c0_i32, %c0_i32_0 : i32, i32
  }
  func.func @transform_4(%arg0: i32) -> (i32, i32) {
    %c0_i32 = arith.constant 0 : i32
    %c0_i32_0 = arith.constant 0 : i32
    %c0_i32_1 = arith.constant 0 : i32
    return %c0_i32, %c0_i32_0 : i32, i32
  }
  func.func @transform_5(%arg0: i32) -> (i32, i32) {
    %c0_i32 = arith.constant 0 : i32
    %c0_i32_0 = arith.constant 0 : i32
    %c0_i32_1 = arith.constant 0 : i32
    return %c0_i32, %c0_i32_0 : i32, i32
  }
  func.func @transform_6(%arg0: i32) -> (i32, i32) {
    %c0_i32 = arith.constant 0 : i32
    %c0_i32_0 = arith.constant 0 : i32
    %c0_i32_1 = arith.constant 0 : i32
    return %c0_i32, %c0_i32_0 : i32, i32
  }
  func.func @transform_7(%arg0: i32) -> (i32, i32) {
    %c0_i32 = arith.constant 0 : i32
    %c0_i32_0 = arith.constant 0 : i32
    return %arg0, %c0_i32 : i32, i32
  }
}

module attributes {stable_mosaic.version = 11 : i64} {
  func.func @kernel(%arg0: i32, %arg1: memref<16x16xf32, #tpu.memory_space<vmem>>, %arg2: memref<16x128xf32, #tpu.memory_space<vmem>>, %arg3: memref<1x128xf32, #tpu.memory_space<vmem>>, %arg4: memref<128x128xf32, #tpu.memory_space<vmem>>, %arg5: memref<1x128xf32, #tpu.memory_space<vmem>>, %arg6: memref<128x128xf32, #tpu.memory_space<vmem>>, %arg7: memref<1x128xf32, #tpu.memory_space<vmem>>, %arg8: memref<16x128xf32, #tpu.memory_space<vmem>>) attributes {dimension_semantics = [#tpu.dimension_semantics<parallel>], iteration_bounds = array<i64: 1>, scalar_prefetch = 0 : i64, scratch_operands = 0 : i64, tpu.core_type = #tpu.core_type<tc>, window_params = [{transform_indices = @transform_0, window_bounds = array<i64: 16, 16>}, {pipeline_mode = #tpu.pipeline_mode<synchronous>, transform_indices = @transform_1, window_bounds = array<i64: 16, 128>}, {pipeline_mode = #tpu.pipeline_mode<synchronous>, transform_indices = @transform_2, window_bounds = array<i64: 1, 128>}, {pipeline_mode = #tpu.pipeline_mode<synchronous>, transform_indices = @transform_3, window_bounds = array<i64: 128, 128>}, {pipeline_mode = #tpu.pipeline_mode<synchronous>, transform_indices = @transform_4, window_bounds = array<i64: 1, 128>}, {pipeline_mode = #tpu.pipeline_mode<synchronous>, transform_indices = @transform_5, window_bounds = array<i64: 128, 128>}, {pipeline_mode = #tpu.pipeline_mode<synchronous>, transform_indices = @transform_6, window_bounds = array<i64: 1, 128>}, {transform_indices = @transform_7, window_bounds = array<i64: 16, 128>}]} {
    %c0 = arith.constant 0 : index
    %c0_0 = arith.constant 0 : index
    %0 = vector.load %arg1[%c0, %c0_0] : memref<16x16xf32, #tpu.memory_space<vmem>>, vector<16x16xf32>
    %c0_1 = arith.constant 0 : index
    %c0_2 = arith.constant 0 : index
    %1 = vector.load %arg2[%c0_1, %c0_2] : memref<16x128xf32, #tpu.memory_space<vmem>>, vector<16x128xf32>
    %c0_3 = arith.constant 0 : index
    %c0_4 = arith.constant 0 : index
    %2 = vector.load %arg3[%c0_3, %c0_4] : memref<1x128xf32, #tpu.memory_space<vmem>>, vector<1x128xf32>
    %cst = arith.constant dense<0.000000e+00> : vector<16x128xf32>
    %3 = tpu.matmul %0, %1, %cst {dimension_numbers = #tpu.dot_dimension_numbers<[1], [0], [0], [1], [0, 0, 1, 1], [], []>} : vector<16x16xf32>, vector<16x128xf32>, vector<16x128xf32> -> vector<16x128xf32>
    %4 = vector.broadcast %2 : vector<1x128xf32> to vector<16x128xf32>
    %5 = arith.addf %3, %4 : vector<16x128xf32>
    %cst_5 = arith.constant 0.000000e+00 : f32
    %6 = vector.broadcast %cst_5 : f32 to vector<16x128xf32>
    %7 = arith.maximumf %5, %6 : vector<16x128xf32>
    %c0_6 = arith.constant 0 : index
    %c0_7 = arith.constant 0 : index
    %8 = vector.load %arg4[%c0_6, %c0_7] : memref<128x128xf32, #tpu.memory_space<vmem>>, vector<128x128xf32>
    %c0_8 = arith.constant 0 : index
    %c0_9 = arith.constant 0 : index
    %9 = vector.load %arg5[%c0_8, %c0_9] : memref<1x128xf32, #tpu.memory_space<vmem>>, vector<1x128xf32>
    %cst_10 = arith.constant dense<0.000000e+00> : vector<16x128xf32>
    %10 = tpu.matmul %7, %8, %cst_10 {dimension_numbers = #tpu.dot_dimension_numbers<[1], [0], [0], [1], [0, 0, 1, 1], [], []>} : vector<16x128xf32>, vector<128x128xf32>, vector<16x128xf32> -> vector<16x128xf32>
    %11 = vector.broadcast %9 : vector<1x128xf32> to vector<16x128xf32>
    %12 = arith.addf %10, %11 : vector<16x128xf32>
    %cst_11 = arith.constant 0.000000e+00 : f32
    %13 = vector.broadcast %cst_11 : f32 to vector<16x128xf32>
    %14 = arith.maximumf %12, %13 : vector<16x128xf32>
    %c0_12 = arith.constant 0 : index
    %c0_13 = arith.constant 0 : index
    %15 = vector.load %arg6[%c0_12, %c0_13] : memref<128x128xf32, #tpu.memory_space<vmem>>, vector<128x128xf32>
    %c0_14 = arith.constant 0 : index
    %c0_15 = arith.constant 0 : index
    %16 = vector.load %arg7[%c0_14, %c0_15] : memref<1x128xf32, #tpu.memory_space<vmem>>, vector<1x128xf32>
    %cst_16 = arith.constant dense<0.000000e+00> : vector<16x128xf32>
    %17 = tpu.matmul %14, %15, %cst_16 {dimension_numbers = #tpu.dot_dimension_numbers<[1], [0], [0], [1], [0, 0, 1, 1], [], []>} : vector<16x128xf32>, vector<128x128xf32>, vector<16x128xf32> -> vector<16x128xf32>
    %18 = vector.broadcast %16 : vector<1x128xf32> to vector<16x128xf32>
    %19 = arith.addf %17, %18 : vector<16x128xf32>
    %c0_17 = arith.constant 0 : index
    %c0_18 = arith.constant 0 : index
    %20 = vector.load %arg8[%c0_17, %c0_18] : memref<16x128xf32, #tpu.memory_space<vmem>>, vector<16x128xf32>
    tpu.vector_store %arg8[%c0_17, %c0_18], %19 {strides = array<i32>} : memref<16x128xf32, #tpu.memory_space<vmem>>, vector<16x128xf32>,
    return
  }
  func.func @transform_0(%arg0: i32) -> (i32, i32) {
    %c0_i32 = arith.constant 0 : i32
    %c0_i32_0 = arith.constant 0 : i32
    return %arg0, %c0_i32 : i32, i32
  }
  func.func @transform_1(%arg0: i32) -> (i32, i32) {
    %c0_i32 = arith.constant 0 : i32
    %c0_i32_0 = arith.constant 0 : i32
    %c0_i32_1 = arith.constant 0 : i32
    return %c0_i32, %c0_i32_0 : i32, i32
  }
  func.func @transform_2(%arg0: i32) -> (i32, i32) {
    %c0_i32 = arith.constant 0 : i32
    %c0_i32_0 = arith.constant 0 : i32
    %c0_i32_1 = arith.constant 0 : i32
    return %c0_i32, %c0_i32_0 : i32, i32
  }
  func.func @transform_3(%arg0: i32) -> (i32, i32) {
    %c0_i32 = arith.constant 0 : i32
    %c0_i32_0 = arith.constant 0 : i32
    %c0_i32_1 = arith.constant 0 : i32
    return %c0_i32, %c0_i32_0 : i32, i32
  }
  func.func @transform_4(%arg0: i32) -> (i32, i32) {
    %c0_i32 = arith.constant 0 : i32
    %c0_i32_0 = arith.constant 0 : i32
    %c0_i32_1 = arith.constant 0 : i32
    return %c0_i32, %c0_i32_0 : i32, i32
  }
  func.func @transform_5(%arg0: i32) -> (i32, i32) {
    %c0_i32 = arith.constant 0 : i32
    %c0_i32_0 = arith.constant 0 : i32
    %c0_i32_1 = arith.constant 0 : i32
    return %c0_i32, %c0_i32_0 : i32, i32
  }
  func.func @transform_6(%arg0: i32) -> (i32, i32) {
    %c0_i32 = arith.constant 0 : i32
    %c0_i32_0 = arith.constant 0 : i32
    %c0_i32_1 = arith.constant 0 : i32
    return %c0_i32, %c0_i32_0 : i32, i32
  }
  func.func @transform_7(%arg0: i32) -> (i32, i32) {
    %c0_i32 = arith.constant 0 : i32
    %c0_i32_0 = arith.constant 0 : i32
    return %arg0, %c0_i32 : i32, i32
  }
}

</mosaic_0001>

<bundles_post_ra>
// kernel: tpu_custom_call.1
= control target key start
LH: loop header
LB: loop body
LE: loop exit
PB: predicated region body
PF: predicated region fallthrough
CT: control target
= control target key end

     0   :  { %12 = vsyncpa [#allocation3], 0  ;;  %s501_s0 = inlined_call_operand.hbm [shape: f32[16,16], index: 0, kind: input, shape index: {}]   ;;  %s502_s1 = inlined_call_operand.hbm [shape: f32[16,128], index: 1, kind: input, shape index: {}]   ;;  %s503_s2 = inlined_call_operand.vmem [shape: f32[1,128], index: 2, kind: input, shape index: {}]   ;;  %s504_s3 = inlined_call_operand.hbm [shape: f32[128,128], index: 3, kind: input, shape index: {}]   ;;  %s505_s4 = inlined_call_operand.vmem [shape: f32[1,128], index: 4, kind: input, shape index: {}]   ;;  %s506_s5 = inlined_call_operand.hbm [shape: f32[128,128], index: 5, kind: input, shape index: {}]   ;;  %s507_s6 = inlined_call_operand.vmem [shape: f32[1,128], index: 6, kind: input, shape index: {}]   ;;  %s508_s7 = inlined_call_operand.hbm [shape: f32[16,128], index: 7, kind: output, shape index: {}]  }
   0x1   :  { %13 = vsyncpa [#allocation6], 0 }
   0x2   :  { %14 = vsyncpa [#allocation9], 0 }
   0x3   :  { %15 = vsyncpa [#allocation4], 0  ;;  %s33_s26 = sshll.u32 %s502_s1, 4  ;;  %s413_s27 = smov [#allocation5]   ;;  %s34_s26 = int_to_ptr.hbm [resolvable:$true] %s33_s26 }
   0x4   :  { %s35_s28 = sshll.u32 %s413_s27, 4  ;;  %s20_s8 = sshll.u32 %s501_s0, 4  ;;  %s36_s28 = int_to_ptr.vmem [resolvable:$true] %s35_s28  ;;  %s21_s8 = int_to_ptr.hbm [resolvable:$true] %s20_s8 }
   0x5   :  { %s414_s9 = smov 128   ;;  %s415_s10 = smov 8  }
   0x6   :  { %41 = dma.hbm_to_vmem [thread:$0]  %s34_s26, 256, %s36_s28, [#allocation6], %s414_s9, %s414_s9, %s415_s10  }
   0x7   :  { %s416_s11 = smov [#allocation2]   ;;  %s48_s1 = sshll.u32 %s504_s3, 4  ;;  %s49_s1 = int_to_ptr.hbm [resolvable:$true] %s48_s1 }
   0x8   :  { %s22_s12 = sshll.u32 %s416_s11, 4  ;;  %s63_s16 = sshll.u32 %s506_s5, 4  ;;  %s23_s12 = int_to_ptr.vmem [resolvable:$true] %s22_s12  ;;  %s64_s16 = int_to_ptr.hbm [resolvable:$true] %s63_s16 }
   0x9   :  { %28 = dma.hbm_to_vmem [thread:$0]  %s21_s8, 256, %s23_s12, [#allocation3], %s414_s9, %s414_s9, %s415_s10  }
   0xa   :  { %s417_s17 = smov [#allocation7]   ;;  %s418_s19 = smov [#allocation8]  }
   0xb   :  { %s50_s18 = sshll.u32 %s417_s17, 4  ;;  %s65_s3 = sshll.u32 %s418_s19, 4  ;;  %s51_s18 = int_to_ptr.vmem [resolvable:$true] %s50_s18  ;;  %s66_s3 = int_to_ptr.vmem [resolvable:$true] %s65_s3 }
   0xc   :  { %56 = dma.hbm_to_vmem [thread:$0]  %s49_s1, 2048, %s51_s18, [#allocation6], %s414_s9, %s414_s9, %s415_s10  }
   0xd   :  { %71 = dma.hbm_to_vmem [thread:$0]  %s64_s16, 2048, %s66_s3, [#allocation9], %s414_s9, %s414_s9, %s415_s10  }
   0xe   :  { %405 = dma.done.wait [#allocation3], 256  }
   0xf   :  { %406 = vsyncadd [#allocation3], 4294967040 }
  0x10   :  { %407 = dma.done.wait [#allocation6], 2304  }
  0x11   :  { %408 = vsyncadd [#allocation6], 4294964992 }
  0x12   :  { %409 = dma.done.wait [#allocation9], 2048  }
  0x13   :  { %410 = vsyncadd [#allocation9], 4294965248  ;;  %v93_v0 = vld [vmem:[#allocation5 + $0x8] sm:$0xff]  ;;  %v92_v1 = vld [vmem:[#allocation5] sm:$0xff]  ;;  %vm98_vm0 = vcmask 130048   ;;  %s419_s24 = smov [#allocation10]  }
  0x14   :  { %119 = vmatpush.msra.mxu0 %v93_v0  ;;  %v90_v2 = vld [vmem:[#allocation2] sm:$0xff]  ;;  %v145_v3 = vld [vmem:[#allocation7 + $0x78] sm:$0xff]  ;;  %v144_v4 = vld [vmem:[#allocation7 + $0x70] sm:$0xff]  ;;  %s224_s25 = sshll.u32 %s419_s24, 4  ;;  %s225_s25 = int_to_ptr.vmem [resolvable:$true] %s224_s25 }
  0x15   :  { %150 = vmatpush.msra.mxu1 %v145_v3  ;;  %243 = vmatpush.msra.mxu3 %v145_v3  ;;  %v143_v5 = vld [vmem:[#allocation7 + $0x68] sm:$0xff]  ;;  %v142_v6 = vld [vmem:[#allocation7 + $0x60] sm:$0xff]  ;;  %v141_v7 = vld [vmem:[#allocation7 + $0x58] sm:$0xff] }
  0x16   :  { %120 = vmatpush.msra.mxu0 %v92_v1  ;;  %v91_v8 = vld [vmem:[#allocation2 + $0x8] sm:$0xff]  ;;  %v140_v9 = vld [vmem:[#allocation7 + $0x50] sm:$0xff]  ;;  %v138_v11 = vld [vmem:[#allocation7 + $0x40] sm:$0xff] }
  0x17   :  { %241 = vmatmul.msk.f32.vlgmr.msra.gmra.mxu0 %vm98_vm0, %v90_v2  ;;  %151 = vmatpush.msra.mxu1 %v144_v4  ;;  %v139_v10 = vld [vmem:[#allocation7 + $0x48] sm:$0xff]  ;;  %v137_v12 = vld [vmem:[#allocation7 + $0x38] sm:$0xff]  ;;  %v136_v13 = vld [vmem:[#allocation7 + $0x30] sm:$0xff] }
  0x18   :  { %244 = vmatpush.msra.mxu3 %v144_v4  ;;  %v135_v14 = vld [vmem:[#allocation7 + $0x28] sm:$0xff]  ;;  %v134_v15 = vld [vmem:[#allocation7 + $0x20] sm:$0xff]  ;;  %v133_v16 = vld [vmem:[#allocation7 + $0x18] sm:$0xff] }
  0x19   :  { %152 = vmatpush.msra.mxu1 %v143_v5  ;;  %v132_v17 = vld [vmem:[#allocation7 + $0x10] sm:$0xff]  ;;  %v131_v18 = vld [vmem:[#allocation7 + $0x8] sm:$0xff]  ;;  %v130_v19 = vld [vmem:[#allocation7] sm:$0xff] }
  0x1a   :  { %245 = vmatpush.msra.mxu3 %v143_v5  ;;  %v190_v20 = vld [vmem:[#allocation8 + $0x78] sm:$0xff]  ;;  %v189_v21 = vld [vmem:[#allocation8 + $0x70] sm:$0xff]  ;;  %v188_v22 = vld [vmem:[#allocation8 + $0x68] sm:$0xff] }
  0x1b   :  { %153 = vmatpush.msra.mxu1 %v142_v6  ;;  %195 = vmatpush.msrb.mxu0 %v190_v20  ;;  %v187_v23 = vld [vmem:[#allocation8 + $0x60] sm:$0xff]  ;;  %v186_v24 = vld [vmem:[#allocation8 + $0x58] sm:$0xff]  ;;  %v185_v25 = vld [vmem:[#allocation8 + $0x50] sm:$0xff] }
  0x1c   :  { %246 = vmatpush.msra.mxu3 %v142_v6  ;;  %259 = vmatpush.msra.mxu2 %v190_v20  ;;  %v184_v26 = vld [vmem:[#allocation8 + $0x48] sm:$0xff]  ;;  %v183_v27 = vld [vmem:[#allocation8 + $0x40] sm:$0xff]  ;;  %v182_v28 = vld [vmem:[#allocation8 + $0x38] sm:$0xff] }
  0x1d   :  { %154 = vmatpush.msra.mxu1 %v141_v7  ;;  %196 = vmatpush.msrb.mxu0 %v189_v21  ;;  %v282_v29 = vld [vmem:[%s503_s2] ss:$0 sm:$0xff]  ;;  %v181_v30 = vld [vmem:[#allocation8 + $0x30] sm:$0xff]  ;;  %v180_v31 = vld [vmem:[#allocation8 + $0x28] sm:$0xff] }
  0x1e   :  { %247 = vmatpush.msra.mxu3 %v141_v7  ;;  %260 = vmatpush.msra.mxu2 %v189_v21  ;;  %v179_v34 = vld [vmem:[#allocation8 + $0x20] sm:$0xff]  ;;  %v178_v36 = vld [vmem:[#allocation8 + $0x18] sm:$0xff]  ;;  %v177_v40 = vld [vmem:[#allocation8 + $0x10] sm:$0xff] }
  0x1f   :  { %242 = vmatmul.msk.f32.gmra.mxu0 %vm98_vm0, %v91_v8  ;;  %155 = vmatpush.msra.mxu1 %v140_v9  ;;  %v176_v41 = vld [vmem:[#allocation8 + $0x8] sm:$0xff]  ;;  %v175_v42 = vld [vmem:[#allocation8] sm:$0xff] }
  0x20   :  { %248 = vmatpush.msra.mxu3 %v140_v9  ;;  %197 = vmatpush.msrb.mxu0 %v188_v22  ;;  %v283_v43 = vld [vmem:[%s505_s4] ss:$0 sm:$0xff]  ;;  %s226_s4 = sshll.u32 %s508_s7, 4  ;;  %s227_s4 = int_to_ptr.hbm [resolvable:$true] %s226_s4 }
  0x21   :  { %156 = vmatpush.msra.mxu1 %v139_v10  ;;  %261 = vmatpush.msra.mxu2 %v188_v22  ;;  %v284_v50 = vld [vmem:[%s507_s6] ss:$0 sm:$0xff] }
  0x22   :  { %249 = vmatpush.msra.mxu3 %v139_v10  ;;  %198 = vmatpush.msrb.mxu0 %v187_v23 }
  0x23   :  { %157 = vmatpush.msra.mxu1 %v138_v11  ;;  %262 = vmatpush.msra.mxu2 %v187_v23 }
  0x24   :  { %250 = vmatpush.msra.mxu3 %v138_v11  ;;  %199 = vmatpush.msrb.mxu0 %v186_v24 }
  0x25   :  { %158 = vmatpush.msra.mxu1 %v137_v12  ;;  %263 = vmatpush.msra.mxu2 %v186_v24 }
  0x26   :  { %251 = vmatpush.msra.mxu3 %v137_v12  ;;  %200 = vmatpush.msrb.mxu0 %v185_v25 }
  0x27   :  { %159 = vmatpush.msra.mxu1 %v136_v13  ;;  %264 = vmatpush.msra.mxu2 %v185_v25 }
  0x28   :  { %252 = vmatpush.msra.mxu3 %v136_v13  ;;  %201 = vmatpush.msrb.mxu0 %v184_v26 }
  0x29   :  { %160 = vmatpush.msra.mxu1 %v135_v14  ;;  %265 = vmatpush.msra.mxu2 %v184_v26 }
  0x2a   :  { %253 = vmatpush.msra.mxu3 %v135_v14  ;;  %202 = vmatpush.msrb.mxu0 %v183_v27 }
  0x2b   :  { %161 = vmatpush.msra.mxu1 %v134_v15  ;;  %266 = vmatpush.msra.mxu2 %v183_v27 }
  0x2c   :  { %254 = vmatpush.msra.mxu3 %v134_v15  ;;  %203 = vmatpush.msrb.mxu0 %v182_v28 }
  0x2d   :  { %162 = vmatpush.msra.mxu1 %v133_v16  ;;  %267 = vmatpush.msra.mxu2 %v182_v28 }
  0x2e   :  { %255 = vmatpush.msra.mxu3 %v133_v16  ;;  %204 = vmatpush.msrb.mxu0 %v181_v30 }
  0x2f   :  { %163 = vmatpush.msra.mxu1 %v132_v17  ;;  %268 = vmatpush.msra.mxu2 %v181_v30 }
  0x30   :  { %256 = vmatpush.msra.mxu3 %v132_v17  ;;  %205 = vmatpush.msrb.mxu0 %v180_v31 }
  0x31   :  { %164 = vmatpush.msra.mxu1 %v131_v18  ;;  %269 = vmatpush.msra.mxu2 %v180_v31 }
  0x32   :  { %257 = vmatpush.msra.mxu3 %v131_v18  ;;  %206 = vmatpush.msrb.mxu0 %v179_v34 }
  0x33   :  { %165 = vmatpush.msra.mxu1 %v130_v19  ;;  %270 = vmatpush.msra.mxu2 %v179_v34 }
  0x34   :  { %258 = vmatpush.msra.mxu3 %v130_v19  ;;  %207 = vmatpush.msrb.mxu0 %v178_v36 }
  0x35   :  { %271 = vmatpush.msra.mxu2 %v178_v36 }
  0x36   :  { %208 = vmatpush.msrb.mxu0 %v177_v40 }
  0x37   :  { %272 = vmatpush.msra.mxu2 %v177_v40 }
  0x38   :  { %209 = vmatpush.msrb.mxu0 %v176_v41 }
  0x39   :  { %273 = vmatpush.msra.mxu2 %v176_v41 }
  0x3a   :  { %210 = vmatpush.msrb.mxu0 %v175_v42 }
  0x3b   :  { %274 = vmatpush.msra.mxu2 %v175_v42 }
  0x94   :  { %v122_v32 = vpop.f32.mrf.mxu0 }
  0x95   :  { %v123_v33 = vadd.f32 %v282_v29, %v122_v32 }
  0x97   :  { %v128_v35 = vmax.f32 %v123_v33, 0.0 }
  0x99   :  { %166 = vmatmul.f32.vlgmr.msra.gmra.mxu1 %v128_v35 }
  0x9c   :  { %v125_v37 = vpop.f32.mrf.mxu0 }
  0x9d   :  { %v126_v38 = vadd.f32 %v282_v29, %v125_v37 }
  0x9f   :  { %v129_v39 = vmax.f32 %v126_v38, 0.0 }
  0xa1   :  { %169 = vmatmul.f32.vlgmr.msra.gmra.mxu3 %v129_v39 }
 0x116   :  { %v167_v44 = vpop.f32.mrf.mxu1 }
 0x117   :  { %v168_v45 = vadd.f32 %v283_v43, %v167_v44 }
 0x119   :  { %v173_v46 = vmax.f32 %v168_v45, 0.0 }
 0x11b   :  { %211 = vmatmul.f32.vlgmr.msrb.gmra.mxu0 %v173_v46 }
 0x124   :  { %v170_v47 = vpop.f32.mrf.mxu3 }
 0x125   :  { %v171_v48 = vadd.f32 %v283_v43, %v170_v47 }
 0x127   :  { %v174_v49 = vmax.f32 %v171_v48, 0.0 }
 0x129   :  { %214 = vmatmul.f32.vlgmr.msra.gmra.mxu2 %v174_v49 }
 0x198   :  { %v212_v51 = vpop.f32.mrf.mxu0 }
 0x199   :  { %v213_v52 = vadd.f32 %v284_v50, %v212_v51 }
 0x19b   :  { %218 = vst [vmem:[#allocation10] sm:$0xff] %v213_v52 }
 0x1ac   :  { %v215_v53 = vpop.f32.mrf.mxu2 }
 0x1ad   :  { %v216_v54 = vadd.f32 %v284_v50, %v215_v53 }
 0x1af   :  { %219 = vst [vmem:[#allocation10 + $0x8] sm:$0xff] %v216_v54 }
 0x1b0   :  { %232 = dma.vmem_to_hbm [thread:$0]  %s225_s25, 256, %s227_s4, [#allocation4], %s414_s9, %s414_s9, %s415_s10  }
 0x1b1   :  { %411 = dma.done.wait [#allocation4], 256  }
 0x1b2   :  { %412 = vsyncadd [#allocation4], 4294967040 }
 0x1b3   :  { %237 = vsyncpa [#allocation3], 1 }
 0x1b4   :  { %238 = vsyncpa [#allocation6], 1 }
 0x1b5   :  { %239 = vsyncpa [#allocation9], 1 }
 0x1b6   :  { %240 = vsyncpa [#allocation4], 1 }

// kernel: tpu_custom_call.1
= control target key start
LH: loop header
LB: loop body
LE: loop exit
PB: predicated region body
PF: predicated region fallthrough
CT: control target
= control target key end

     0   :  { %12 = vsyncpa [#allocation3], 0  ;;  %s501_s0 = inlined_call_operand.hbm [shape: f32[16,16], index: 0, kind: input, shape index: {}]   ;;  %s502_s1 = inlined_call_operand.hbm [shape: f32[16,128], index: 1, kind: input, shape index: {}]   ;;  %s503_s2 = inlined_call_operand.vmem [shape: f32[1,128], index: 2, kind: input, shape index: {}]   ;;  %s504_s3 = inlined_call_operand.hbm [shape: f32[128,128], index: 3, kind: input, shape index: {}]   ;;  %s505_s4 = inlined_call_operand.vmem [shape: f32[1,128], index: 4, kind: input, shape index: {}]   ;;  %s506_s5 = inlined_call_operand.hbm [shape: f32[128,128], index: 5, kind: input, shape index: {}]   ;;  %s507_s6 = inlined_call_operand.vmem [shape: f32[1,128], index: 6, kind: input, shape index: {}]   ;;  %s508_s7 = inlined_call_operand.hbm [shape: f32[16,128], index: 7, kind: output, shape index: {}]  }
   0x1   :  { %13 = vsyncpa [#allocation6], 0 }
   0x2   :  { %14 = vsyncpa [#allocation9], 0 }
   0x3   :  { %15 = vsyncpa [#allocation4], 0  ;;  %s33_s26 = sshll.u32 %s502_s1, 4  ;;  %s413_s27 = smov [#allocation5]   ;;  %s34_s26 = int_to_ptr.hbm [resolvable:$true] %s33_s26 }
   0x4   :  { %s35_s28 = sshll.u32 %s413_s27, 4  ;;  %s20_s8 = sshll.u32 %s501_s0, 4  ;;  %s36_s28 = int_to_ptr.vmem [resolvable:$true] %s35_s28  ;;  %s21_s8 = int_to_ptr.hbm [resolvable:$true] %s20_s8 }
   0x5   :  { %s414_s9 = smov 128   ;;  %s415_s10 = smov 8  }
   0x6   :  { %41 = dma.hbm_to_vmem [thread:$0]  %s34_s26, 256, %s36_s28, [#allocation6], %s414_s9, %s414_s9, %s415_s10  }
   0x7   :  { %s416_s11 = smov [#allocation2]   ;;  %s48_s1 = sshll.u32 %s504_s3, 4  ;;  %s49_s1 = int_to_ptr.hbm [resolvable:$true] %s48_s1 }
   0x8   :  { %s22_s12 = sshll.u32 %s416_s11, 4  ;;  %s63_s16 = sshll.u32 %s506_s5, 4  ;;  %s23_s12 = int_to_ptr.vmem [resolvable:$true] %s22_s12  ;;  %s64_s16 = int_to_ptr.hbm [resolvable:$true] %s63_s16 }
   0x9   :  { %28 = dma.hbm_to_vmem [thread:$0]  %s21_s8, 256, %s23_s12, [#allocation3], %s414_s9, %s414_s9, %s415_s10  }
   0xa   :  { %s417_s17 = smov [#allocation7]   ;;  %s418_s19 = smov [#allocation8]  }
   0xb   :  { %s50_s18 = sshll.u32 %s417_s17, 4  ;;  %s65_s3 = sshll.u32 %s418_s19, 4  ;;  %s51_s18 = int_to_ptr.vmem [resolvable:$true] %s50_s18  ;;  %s66_s3 = int_to_ptr.vmem [resolvable:$true] %s65_s3 }
   0xc   :  { %56 = dma.hbm_to_vmem [thread:$0]  %s49_s1, 2048, %s51_s18, [#allocation6], %s414_s9, %s414_s9, %s415_s10  }
   0xd   :  { %71 = dma.hbm_to_vmem [thread:$0]  %s64_s16, 2048, %s66_s3, [#allocation9], %s414_s9, %s414_s9, %s415_s10  }
   0xe   :  { %405 = dma.done.wait [#allocation3], 256  }
   0xf   :  { %406 = vsyncadd [#allocation3], 4294967040 }
  0x10   :  { %407 = dma.done.wait [#allocation6], 2304  }
  0x11   :  { %408 = vsyncadd [#allocation6], 4294964992 }
  0x12   :  { %409 = dma.done.wait [#allocation9], 2048  }
  0x13   :  { %410 = vsyncadd [#allocation9], 4294965248  ;;  %v93_v0 = vld [vmem:[#allocation5 + $0x8] sm:$0xff]  ;;  %v92_v1 = vld [vmem:[#allocation5] sm:$0xff]  ;;  %vm98_vm0 = vcmask 130048   ;;  %s419_s24 = smov [#allocation10]  }
  0x14   :  { %119 = vmatpush.msra.mxu0 %v93_v0  ;;  %v90_v2 = vld [vmem:[#allocation2] sm:$0xff]  ;;  %v145_v3 = vld [vmem:[#allocation7 + $0x78] sm:$0xff]  ;;  %v144_v4 = vld [vmem:[#allocation7 + $0x70] sm:$0xff]  ;;  %s224_s25 = sshll.u32 %s419_s24, 4  ;;  %s225_s25 = int_to_ptr.vmem [resolvable:$true] %s224_s25 }
  0x15   :  { %150 = vmatpush.msra.mxu1 %v145_v3  ;;  %243 = vmatpush.msra.mxu3 %v145_v3  ;;  %v143_v5 = vld [vmem:[#allocation7 + $0x68] sm:$0xff]  ;;  %v142_v6 = vld [vmem:[#allocation7 + $0x60] sm:$0xff]  ;;  %v141_v7 = vld [vmem:[#allocation7 + $0x58] sm:$0xff] }
  0x16   :  { %120 = vmatpush.msra.mxu0 %v92_v1  ;;  %v91_v8 = vld [vmem:[#allocation2 + $0x8] sm:$0xff]  ;;  %v140_v9 = vld [vmem:[#allocation7 + $0x50] sm:$0xff]  ;;  %v138_v11 = vld [vmem:[#allocation7 + $0x40] sm:$0xff] }
  0x17   :  { %241 = vmatmul.msk.f32.vlgmr.msra.gmra.mxu0 %vm98_vm0, %v90_v2  ;;  %151 = vmatpush.msra.mxu1 %v144_v4  ;;  %v139_v10 = vld [vmem:[#allocation7 + $0x48] sm:$0xff]  ;;  %v137_v12 = vld [vmem:[#allocation7 + $0x38] sm:$0xff]  ;;  %v136_v13 = vld [vmem:[#allocation7 + $0x30] sm:$0xff] }
  0x18   :  { %244 = vmatpush.msra.mxu3 %v144_v4  ;;  %v135_v14 = vld [vmem:[#allocation7 + $0x28] sm:$0xff]  ;;  %v134_v15 = vld [vmem:[#allocation7 + $0x20] sm:$0xff]  ;;  %v133_v16 = vld [vmem:[#allocation7 + $0x18] sm:$0xff] }
  0x19   :  { %152 = vmatpush.msra.mxu1 %v143_v5  ;;  %v132_v17 = vld [vmem:[#allocation7 + $0x10] sm:$0xff]  ;;  %v131_v18 = vld [vmem:[#allocation7 + $0x8] sm:$0xff]  ;;  %v130_v19 = vld [vmem:[#allocation7] sm:$0xff] }
  0x1a   :  { %245 = vmatpush.msra.mxu3 %v143_v5  ;;  %v190_v20 = vld [vmem:[#allocation8 + $0x78] sm:$0xff]  ;;  %v189_v21 = vld [vmem:[#allocation8 + $0x70] sm:$0xff]  ;;  %v188_v22 = vld [vmem:[#allocation8 + $0x68] sm:$0xff] }
  0x1b   :  { %153 = vmatpush.msra.mxu1 %v142_v6  ;;  %195 = vmatpush.msrb.mxu0 %v190_v20  ;;  %v187_v23 = vld [vmem:[#allocation8 + $0x60] sm:$0xff]  ;;  %v186_v24 = vld [vmem:[#allocation8 + $0x58] sm:$0xff]  ;;  %v185_v25 = vld [vmem:[#allocation8 + $0x50] sm:$0xff] }
  0x1c   :  { %246 = vmatpush.msra.mxu3 %v142_v6  ;;  %259 = vmatpush.msra.mxu2 %v190_v20  ;;  %v184_v26 = vld [vmem:[#allocation8 + $0x48] sm:$0xff]  ;;  %v183_v27 = vld [vmem:[#allocation8 + $0x40] sm:$0xff]  ;;  %v182_v28 = vld [vmem:[#allocation8 + $0x38] sm:$0xff] }
  0x1d   :  { %154 = vmatpush.msra.mxu1 %v141_v7  ;;  %196 = vmatpush.msrb.mxu0 %v189_v21  ;;  %v282_v29 = vld [vmem:[%s503_s2] ss:$0 sm:$0xff]  ;;  %v181_v30 = vld [vmem:[#allocation8 + $0x30] sm:$0xff]  ;;  %v180_v31 = vld [vmem:[#allocation8 + $0x28] sm:$0xff] }
  0x1e   :  { %247 = vmatpush.msra.mxu3 %v141_v7  ;;  %260 = vmatpush.msra.mxu2 %v189_v21  ;;  %v179_v34 = vld [vmem:[#allocation8 + $0x20] sm:$0xff]  ;;  %v178_v36 = vld [vmem:[#allocation8 + $0x18] sm:$0xff]  ;;  %v177_v40 = vld [vmem:[#allocation8 + $0x10] sm:$0xff] }
  0x1f   :  { %242 = vmatmul.msk.f32.gmra.mxu0 %vm98_vm0, %v91_v8  ;;  %155 = vmatpush.msra.mxu1 %v140_v9  ;;  %v176_v41 = vld [vmem:[#allocation8 + $0x8] sm:$0xff]  ;;  %v175_v42 = vld [vmem:[#allocation8] sm:$0xff] }
  0x20   :  { %248 = vmatpush.msra.mxu3 %v140_v9  ;;  %197 = vmatpush.msrb.mxu0 %v188_v22  ;;  %v283_v43 = vld [vmem:[%s505_s4] ss:$0 sm:$0xff]  ;;  %s226_s4 = sshll.u32 %s508_s7, 4  ;;  %s227_s4 = int_to_ptr.hbm [resolvable:$true] %s226_s4 }
  0x21   :  { %156 = vmatpush.msra.mxu1 %v139_v10  ;;  %261 = vmatpush.msra.mxu2 %v188_v22  ;;  %v284_v50 = vld [vmem:[%s507_s6] ss:$0 sm:$0xff] }
  0x22   :  { %249 = vmatpush.msra.mxu3 %v139_v10  ;;  %198 = vmatpush.msrb.mxu0 %v187_v23 }
  0x23   :  { %157 = vmatpush.msra.mxu1 %v138_v11  ;;  %262 = vmatpush.msra.mxu2 %v187_v23 }
  0x24   :  { %250 = vmatpush.msra.mxu3 %v138_v11  ;;  %199 = vmatpush.msrb.mxu0 %v186_v24 }
  0x25   :  { %158 = vmatpush.msra.mxu1 %v137_v12  ;;  %263 = vmatpush.msra.mxu2 %v186_v24 }
  0x26   :  { %251 = vmatpush.msra.mxu3 %v137_v12  ;;  %200 = vmatpush.msrb.mxu0 %v185_v25 }
  0x27   :  { %159 = vmatpush.msra.mxu1 %v136_v13  ;;  %264 = vmatpush.msra.mxu2 %v185_v25 }
  0x28   :  { %252 = vmatpush.msra.mxu3 %v136_v13  ;;  %201 = vmatpush.msrb.mxu0 %v184_v26 }
  0x29   :  { %160 = vmatpush.msra.mxu1 %v135_v14  ;;  %265 = vmatpush.msra.mxu2 %v184_v26 }
  0x2a   :  { %253 = vmatpush.msra.mxu3 %v135_v14  ;;  %202 = vmatpush.msrb.mxu0 %v183_v27 }
  0x2b   :  { %161 = vmatpush.msra.mxu1 %v134_v15  ;;  %266 = vmatpush.msra.mxu2 %v183_v27 }
  0x2c   :  { %254 = vmatpush.msra.mxu3 %v134_v15  ;;  %203 = vmatpush.msrb.mxu0 %v182_v28 }
  0x2d   :  { %162 = vmatpush.msra.mxu1 %v133_v16  ;;  %267 = vmatpush.msra.mxu2 %v182_v28 }
  0x2e   :  { %255 = vmatpush.msra.mxu3 %v133_v16  ;;  %204 = vmatpush.msrb.mxu0 %v181_v30 }
  0x2f   :  { %163 = vmatpush.msra.mxu1 %v132_v17  ;;  %268 = vmatpush.msra.mxu2 %v181_v30 }
  0x30   :  { %256 = vmatpush.msra.mxu3 %v132_v17  ;;  %205 = vmatpush.msrb.mxu0 %v180_v31 }
  0x31   :  { %164 = vmatpush.msra.mxu1 %v131_v18  ;;  %269 = vmatpush.msra.mxu2 %v180_v31 }
  0x32   :  { %257 = vmatpush.msra.mxu3 %v131_v18  ;;  %206 = vmatpush.msrb.mxu0 %v179_v34 }
  0x33   :  { %165 = vmatpush.msra.mxu1 %v130_v19  ;;  %270 = vmatpush.msra.mxu2 %v179_v34 }
  0x34   :  { %258 = vmatpush.msra.mxu3 %v130_v19  ;;  %207 = vmatpush.msrb.mxu0 %v178_v36 }
  0x35   :  { %271 = vmatpush.msra.mxu2 %v178_v36 }
  0x36   :  { %208 = vmatpush.msrb.mxu0 %v177_v40 }
  0x37   :  { %272 = vmatpush.msra.mxu2 %v177_v40 }
  0x38   :  { %209 = vmatpush.msrb.mxu0 %v176_v41 }
  0x39   :  { %273 = vmatpush.msra.mxu2 %v176_v41 }
  0x3a   :  { %210 = vmatpush.msrb.mxu0 %v175_v42 }
  0x3b   :  { %274 = vmatpush.msra.mxu2 %v175_v42 }
  0x94   :  { %v122_v32 = vpop.f32.mrf.mxu0 }
  0x95   :  { %v123_v33 = vadd.f32 %v282_v29, %v122_v32 }
  0x97   :  { %v128_v35 = vmax.f32 %v123_v33, 0.0 }
  0x99   :  { %166 = vmatmul.f32.vlgmr.msra.gmra.mxu1 %v128_v35 }
  0x9c   :  { %v125_v37 = vpop.f32.mrf.mxu0 }
  0x9d   :  { %v126_v38 = vadd.f32 %v282_v29, %v125_v37 }
  0x9f   :  { %v129_v39 = vmax.f32 %v126_v38, 0.0 }
  0xa1   :  { %169 = vmatmul.f32.vlgmr.msra.gmra.mxu3 %v129_v39 }
 0x116   :  { %v167_v44 = vpop.f32.mrf.mxu1 }
 0x117   :  { %v168_v45 = vadd.f32 %v283_v43, %v167_v44 }
 0x119   :  { %v173_v46 = vmax.f32 %v168_v45, 0.0 }
 0x11b   :  { %211 = vmatmul.f32.vlgmr.msrb.gmra.mxu0 %v173_v46 }
 0x124   :  { %v170_v47 = vpop.f32.mrf.mxu3 }
 0x125   :  { %v171_v48 = vadd.f32 %v283_v43, %v170_v47 }
 0x127   :  { %v174_v49 = vmax.f32 %v171_v48, 0.0 }
 0x129   :  { %214 = vmatmul.f32.vlgmr.msra.gmra.mxu2 %v174_v49 }
 0x198   :  { %v212_v51 = vpop.f32.mrf.mxu0 }
 0x199   :  { %v213_v52 = vadd.f32 %v284_v50, %v212_v51 }
 0x19b   :  { %218 = vst [vmem:[#allocation10] sm:$0xff] %v213_v52 }
 0x1ac   :  { %v215_v53 = vpop.f32.mrf.mxu2 }
 0x1ad   :  { %v216_v54 = vadd.f32 %v284_v50, %v215_v53 }
 0x1af   :  { %219 = vst [vmem:[#allocation10 + $0x8] sm:$0xff] %v216_v54 }
 0x1b0   :  { %232 = dma.vmem_to_hbm [thread:$0]  %s225_s25, 256, %s227_s4, [#allocation4], %s414_s9, %s414_s9, %s415_s10  }
 0x1b1   :  { %411 = dma.done.wait [#allocation4], 256  }
 0x1b2   :  { %412 = vsyncadd [#allocation4], 4294967040 }
 0x1b3   :  { %237 = vsyncpa [#allocation3], 1 }
 0x1b4   :  { %238 = vsyncpa [#allocation6], 1 }
 0x1b5   :  { %239 = vsyncpa [#allocation9], 1 }
 0x1b6   :  { %240 = vsyncpa [#allocation4], 1 }

</bundles_post_ra>
